<compile_context>
chip_gen: v6e
topology: v6e:2x2x1
jax: 0.10.0
libtpu: 0.0.40
codegen_flags: <defaults>
</compile_context>

<pallas_src>
import jax
import jax.numpy as jnp
from jax.experimental import pallas as pl
from jax.experimental.pallas import tpu as pltpu


def _round_up(n, m):
    return ((n + m - 1) // m) * m


_SUBLANE = 16          # bf16 row packing for the x tile
_TILE_B_MAX = 2048     # ~10 MiB live VMEM per step; safe on every generation


def _attn_cls_kernel(x_ref, wa_ref, ba_ref, w2_ref, b2_ref, out_ref):
    # x tile: (TILE_B, E) bf16 (cast on host) -> MXU, f32 accumulation.
    h = jnp.dot(x_ref[...], wa_ref[...], preferred_element_type=jnp.float32) + ba_ref[...]
    h = jnp.maximum(h, 0.0)                                    # ReLU in f32 (VPU)
    logits = jnp.dot(h.astype(jnp.bfloat16), w2_ref[...],
                     preferred_element_type=jnp.float32) + b2_ref[...]
    out_ref[...] = jax.nn.sigmoid(logits)                      # sigmoid in f32 (EUP)


def prepare_params(params):
    """One-time host-side folding of all pre-ReLU affine ops (eval mode)."""
    # pre-ReLU = x @ (W1 @ Wo @ Wv).T
    #            + [ pos @ (W1@Wo@Wv).T + ((bv @ Wo.T + bo) @ W1.T + b1) ]
    w_a = params["w1"] @ params["wo"] @ params["wv"]                          # (H, E)
    b_a = (params["bv"] @ params["wo"].T + params["bo"]) @ params["w1"].T + params["b1"]
    b_a = (b_a + params["pos"] @ w_a.T).astype(jnp.float32)                   # (1, H)

    H, E = w_a.shape
    C = params["w2"].shape[0]
    C_pad = _round_up(max(C, 128), 128)

    # Transposed-at-rest ([in,out]) bf16 MXU operands; classes padded to 128 lanes.
    wa_t = w_a.T.astype(jnp.bfloat16)                                          # (E, H)
    w2_t = jnp.zeros((H, C_pad), jnp.bfloat16).at[:, :C].set(
        params["w2"].T.astype(jnp.bfloat16))                                  # (H, C_pad)
    b2_p = jnp.zeros((1, C_pad), jnp.float32).at[:, :C].set(
        params["b2"].reshape(-1).astype(jnp.float32))                         # (1, C_pad)

    return {"wa_t": wa_t, "b_a": b_a, "w2_t": w2_t, "b2_p": b2_p,
            "num_classes": C}


def _choose_batch_tiling(B):
    """Pick (tile_b, B_pad): mostly-full last tile, >=2 steps when worth it."""
    B_min = _round_up(max(B, _SUBLANE), _SUBLANE)
    if B_min <= _TILE_B_MAX:
        # Split across 2 grid steps only when there is enough work to keep
        # both v7x TensorCores busy; tiny batches stay in a single tile.
        n_tiles = 2 if B_min >= 512 else 1
    else:
        n_tiles = pl.cdiv(B_min, _TILE_B_MAX)
    tile_b = _round_up(pl.cdiv(B_min, n_tiles), _SUBLANE)
    return tile_b, n_tiles * tile_b


def attention_instance_classifier(x, prepared):
    """x: (B, E) float32.  prepared: output of prepare_params()."""
    B, E = x.shape
    wa_t, b_a = prepared["wa_t"], prepared["b_a"]
    w2_t, b2_p = prepared["w2_t"], prepared["b2_p"]
    C = prepared["num_classes"]
    H = wa_t.shape[1]
    C_pad = w2_t.shape[1]

    tile_b, B_pad = _choose_batch_tiling(B)

    # bf16 on the wire for the dominant HBM stream; pad batch rows only.
    x_b = x.astype(jnp.bfloat16)
    if B_pad != B:
        x_b = jnp.zeros((B_pad, E), jnp.bfloat16).at[:B].set(x_b)

    out = pl.pallas_call(
        _attn_cls_kernel,
        out_shape=jax.ShapeDtypeStruct((B_pad, C_pad), jnp.float32),
        grid=(B_pad // tile_b,),
        in_specs=[
            pl.BlockSpec((tile_b, E), lambda i: (i, 0)),     # x tile (pipelined, bf16)
            pl.BlockSpec((E, H), lambda i: (0, 0)),          # fused weight, resident
            pl.BlockSpec((1, H), lambda i: (0, 0)),          # fused bias, resident
            pl.BlockSpec((H, C_pad), lambda i: (0, 0)),      # classifier[3] weight, resident
            pl.BlockSpec((1, C_pad), lambda i: (0, 0)),      # classifier[3] bias, resident
        ],
        out_specs=pl.BlockSpec((tile_b, C_pad), lambda i: (i, 0)),
        compiler_params=pltpu.CompilerParams(
            dimension_semantics=("parallel",),               # shard batch tiles across TCs
            vmem_limit_bytes=32 * 1024 * 1024),              # safe headroom on v5e/v6e/v7x
    )(x_b, wa_t, b_a, w2_t, b2_p)

    return out[:B, :C]


def init_params(key, input_dim, num_classes, attention_dim=512):
    """Deterministic synthetic parameters matching the PyTorch module's shapes."""
    ks = jax.random.split(key, 10)
    s = 0.02
    E, H, C = input_dim, attention_dim, num_classes
    # nn.MultiheadAttention: only the V slice of in_proj and the output
    # projection matter for a length-1 sequence (Q/K cancel through softmax).
    return {
        "pos": jax.random.normal(ks[0], (1, E), jnp.float32),        # pos_encoding (1,1,E) squeezed
        "wv":  s * jax.random.normal(ks[1], (E, E), jnp.float32),    # in_proj_weight[2E:3E, :]
        "bv":  s * jax.random.normal(ks[2], (1, E), jnp.float32),    # in_proj_bias[2E:3E]
        "wo":  s * jax.random.normal(ks[3], (E, E), jnp.float32),    # out_proj.weight
        "bo":  s * jax.random.normal(ks[4], (1, E), jnp.float32),    # out_proj.bias
        "w1":  s * jax.random.normal(ks[5], (H, E), jnp.float32),    # classifier[0].weight
        "b1":  s * jax.random.normal(ks[6], (1, H), jnp.float32),    # classifier[0].bias
        "w2":  s * jax.random.normal(ks[7], (C, H), jnp.float32),    # classifier[3].weight
        "b2":  s * jax.random.normal(ks[8], (1, C), jnp.float32),    # classifier[3].bias
    }


if __name__ == "__main__":
    B = 8            # batch
    E = 64           # input_dim (divisible by num_heads=4)
    C = 8            # num_classes
    H = 512          # attention_dim (hard-coded in the module)

    key = jax.random.PRNGKey(0)
    kx, kp = jax.random.split(key)
    x = jax.random.normal(kx, (B, E), jnp.float32)
    params = init_params(kp, input_dim=E, num_classes=C, attention_dim=H)

    prepared = prepare_params(params)           # one-time weight folding / casting
    out = attention_instance_classifier(x, prepared)
    out = jax.block_until_ready(out)

    assert out.shape == (B, C)
    assert bool(jnp.all(jnp.isfinite(out)))
    assert bool(jnp.all((out >= 0.0) & (out <= 1.0)))
    print("KERNEL_OK")
</pallas_src>

<mosaic_0001>
module attributes {stable_mosaic.version = 11 : i64} {
  func.func @_attn_cls_kernel(%arg0: i32, %arg1: memref<16x64xbf16, #tpu.memory_space<vmem>>, %arg2: memref<64x512xbf16, #tpu.memory_space<vmem>>, %arg3: memref<1x512xf32, #tpu.memory_space<vmem>>, %arg4: memref<512x128xbf16, #tpu.memory_space<vmem>>, %arg5: memref<1x128xf32, #tpu.memory_space<vmem>>, %arg6: memref<16x128xf32, #tpu.memory_space<vmem>>) attributes {dimension_semantics = [#tpu.dimension_semantics<parallel>], iteration_bounds = array<i64: 1>, scalar_prefetch = 0 : i64, scratch_operands = 0 : i64, tpu.core_type = #tpu.core_type<tc>, window_params = [{transform_indices = @transform_0, window_bounds = array<i64: 16, 64>}, {pipeline_mode = #tpu.pipeline_mode<synchronous>, transform_indices = @transform_1, window_bounds = array<i64: 64, 512>}, {pipeline_mode = #tpu.pipeline_mode<synchronous>, transform_indices = @transform_2, window_bounds = array<i64: 1, 512>}, {pipeline_mode = #tpu.pipeline_mode<synchronous>, transform_indices = @transform_3, window_bounds = array<i64: 512, 128>}, {pipeline_mode = #tpu.pipeline_mode<synchronous>, transform_indices = @transform_4, window_bounds = array<i64: 1, 128>}, {transform_indices = @transform_5, window_bounds = array<i64: 16, 128>}]} {
    %c0 = arith.constant 0 : index
    %c0_0 = arith.constant 0 : index
    %0 = vector.load %arg1[%c0, %c0_0] : memref<16x64xbf16, #tpu.memory_space<vmem>>, vector<16x64xbf16>
    %c0_1 = arith.constant 0 : index
    %c0_2 = arith.constant 0 : index
    %1 = vector.load %arg2[%c0_1, %c0_2] : memref<64x512xbf16, #tpu.memory_space<vmem>>, vector<64x512xbf16>
    %cst = arith.constant dense<0.000000e+00> : vector<16x512xf32>
    %2 = tpu.matmul %0, %1, %cst {dimension_numbers = #tpu.dot_dimension_numbers<[1], [0], [0], [1], [0, 0, 1, 1], [], []>} : vector<16x64xbf16>, vector<64x512xbf16>, vector<16x512xf32> -> vector<16x512xf32>
    %c0_3 = arith.constant 0 : index
    %c0_4 = arith.constant 0 : index
    %3 = vector.load %arg3[%c0_3, %c0_4] : memref<1x512xf32, #tpu.memory_space<vmem>>, vector<1x512xf32>
    %4 = vector.broadcast %3 : vector<1x512xf32> to vector<16x512xf32>
    %5 = arith.addf %2, %4 : vector<16x512xf32>
    %cst_5 = arith.constant 0.000000e+00 : f32
    %6 = vector.broadcast %cst_5 : f32 to vector<16x512xf32>
    %7 = arith.maximumf %5, %6 : vector<16x512xf32>
    %8 = arith.truncf %7 : vector<16x512xf32> to vector<16x512xbf16>
    %c0_6 = arith.constant 0 : index
    %c0_7 = arith.constant 0 : index
    %9 = vector.load %arg4[%c0_6, %c0_7] : memref<512x128xbf16, #tpu.memory_space<vmem>>, vector<512x128xbf16>
    %cst_8 = arith.constant dense<0.000000e+00> : vector<16x128xf32>
    %10 = tpu.matmul %8, %9, %cst_8 {dimension_numbers = #tpu.dot_dimension_numbers<[1], [0], [0], [1], [0, 0, 1, 1], [], []>} : vector<16x512xbf16>, vector<512x128xbf16>, vector<16x128xf32> -> vector<16x128xf32>
    %c0_9 = arith.constant 0 : index
    %c0_10 = arith.constant 0 : index
    %11 = vector.load %arg5[%c0_9, %c0_10] : memref<1x128xf32, #tpu.memory_space<vmem>>, vector<1x128xf32>
    %12 = vector.broadcast %11 : vector<1x128xf32> to vector<16x128xf32>
    %13 = arith.addf %10, %12 : vector<16x128xf32>
    %14 = arith.negf %13 : vector<16x128xf32>
    %15 = math.exp %14 : vector<16x128xf32>
    %cst_11 = arith.constant 1.000000e+00 : f32
    %16 = vector.broadcast %cst_11 : f32 to vector<16x128xf32>
    %17 = arith.addf %16, %15 : vector<16x128xf32>
    %18 = arith.divf %16, %17 : vector<16x128xf32>
    %c0_12 = arith.constant 0 : index
    %c0_13 = arith.constant 0 : index
    %19 = vector.load %arg6[%c0_12, %c0_13] : memref<16x128xf32, #tpu.memory_space<vmem>>, vector<16x128xf32>
    tpu.vector_store %arg6[%c0_12, %c0_13], %18 {strides = array<i32>} : memref<16x128xf32, #tpu.memory_space<vmem>>, vector<16x128xf32>,
    return
  }
  func.func @transform_0(%arg0: i32) -> (i32, i32) {
    %c0_i32 = arith.constant 0 : i32
    %c0_i32_0 = arith.constant 0 : i32
    return %arg0, %c0_i32 : i32, i32
  }
  func.func @transform_1(%arg0: i32) -> (i32, i32) {
    %c0_i32 = arith.constant 0 : i32
    %c0_i32_0 = arith.constant 0 : i32
    %c0_i32_1 = arith.constant 0 : i32
    return %c0_i32, %c0_i32_0 : i32, i32
  }
  func.func @transform_2(%arg0: i32) -> (i32, i32) {
    %c0_i32 = arith.constant 0 : i32
    %c0_i32_0 = arith.constant 0 : i32
    %c0_i32_1 = arith.constant 0 : i32
    return %c0_i32, %c0_i32_0 : i32, i32
  }
  func.func @transform_3(%arg0: i32) -> (i32, i32) {
    %c0_i32 = arith.constant 0 : i32
    %c0_i32_0 = arith.constant 0 : i32
    %c0_i32_1 = arith.constant 0 : i32
    return %c0_i32, %c0_i32_0 : i32, i32
  }
  func.func @transform_4(%arg0: i32) -> (i32, i32) {
    %c0_i32 = arith.constant 0 : i32
    %c0_i32_0 = arith.constant 0 : i32
    %c0_i32_1 = arith.constant 0 : i32
    return %c0_i32, %c0_i32_0 : i32, i32
  }
  func.func @transform_5(%arg0: i32) -> (i32, i32) {
    %c0_i32 = arith.constant 0 : i32
    %c0_i32_0 = arith.constant 0 : i32
    return %arg0, %c0_i32 : i32, i32
  }
}

</mosaic_0001>

<bundles_post_ra>
// kernel: tpu_custom_call.1
= control target key start
LH: loop header
LB: loop body
LE: loop exit
PB: predicated region body
PF: predicated region fallthrough
CT: control target
= control target key end

     0   :  { %10 = vsyncpa [#allocation3], 0  ;;  %s1023_s0 = inlined_call_operand.hbm [shape: bf16[16,64], index: 0, kind: input, shape index: {}]   ;;  %s1024_s1 = inlined_call_operand.hbm [shape: bf16[64,512], index: 1, kind: input, shape index: {}]   ;;  %s1025_s2 = inlined_call_operand.hbm [shape: f32[1,512], index: 2, kind: input, shape index: {}]   ;;  %s1026_s3 = inlined_call_operand.hbm [shape: bf16[512,128], index: 3, kind: input, shape index: {}]   ;;  %s1027_s4 = inlined_call_operand.vmem [shape: f32[1,128], index: 4, kind: input, shape index: {}]   ;;  %s1028_s5 = inlined_call_operand.hbm [shape: f32[16,128], index: 5, kind: output, shape index: {}]  }
   0x1   :  { %11 = vsyncpa [#allocation6], 0 }
   0x2   :  { %12 = vsyncpa [#allocation9], 0 }
   0x3   :  { %13 = vsyncpa [#allocation4], 0  ;;  %s963_s18 = smov [#allocation5]  }
   0x4   :  { %s31_s19 = sshll.u32 %s963_s18, 4  ;;  %s32_s19 = int_to_ptr.vmem [resolvable:$true] %s31_s19 }
   0x5   :  { %s863_s20 = scalar_lea.vmem %s32_s19, 2048  ;;  %p868_p1 = scmp.lt.s32.totalorder %s32_s19, %s32_s19 }
   0x6   :  { %p864_p0 = scmp.ne.s32.totalorder %s32_s19, %s863_s20  ;;  %p869_p2 = scmp.lt.s32.totalorder %s863_s20, %s863_s20 }
   0x8   :  { %p870_p3 = por %p869_p2, %p868_p1 }
   0xa   :  { %p871_p4 = pnand %p870_p3, %p864_p0 }
   0xc   :  { %874 = shalt.err (!%p871_p4)
}
   0xd   :  { %s964_s21 = smov 256   ;;  %s965_s22 = smov 16  }
   0xe   :  { %37 = dma.hbm_to_vmem [thread:$0]  %s1024_s1, 2048, %s32_s19, [#allocation6], %s964_s21, %s964_s21, %s965_s22  }
   0xf   :  { %s966_s25 = smov [#allocation2]  }
  0x10   :  { %s19_s26 = sshll.u32 %s966_s25, 4  ;;  %s20_s26 = int_to_ptr.vmem [resolvable:$true] %s19_s26 }
  0x11   :  { %s883_s27 = scalar_lea.vmem %s20_s26, 128  ;;  %p888_p6 = scmp.lt.s32.totalorder %s20_s26, %s20_s26 }
  0x12   :  { %p884_p5 = scmp.ne.s32.totalorder %s20_s26, %s883_s27  ;;  %p889_p7 = scmp.lt.s32.totalorder %s883_s27, %s883_s27 }
  0x14   :  { %p890_p8 = por %p889_p7, %p888_p6 }
  0x16   :  { %p891_p9 = pnand %p890_p8, %p884_p5 }
  0x18   :  { %894 = shalt.err (!%p891_p9)
}
  0x19   :  { %s967_s28 = smov 64   ;;  %s968_s29 = smov 4  }
  0x1a   :  { %25 = dma.hbm_to_vmem [thread:$0]  %s1023_s0, 128, %s20_s26, [#allocation3], %s967_s28, %s967_s28, %s968_s29  }
  0x1b   :  { %s969_s7 = smov [#allocation7]   ;;  %s970_s9 = smov [#allocation8]  }
  0x1c   :  { %s44_s8 = sshll.u32 %s969_s7, 4  ;;  %s53_s1 = sshll.u32 %s970_s9, 4  ;;  %s45_s8 = int_to_ptr.vmem [resolvable:$true] %s44_s8  ;;  %s54_s1 = int_to_ptr.vmem [resolvable:$true] %s53_s1 }
  0x1d   :  { %s903_s10 = scalar_lea.vmem %s45_s8, 64  ;;  %p908_p11 = scmp.lt.s32.totalorder %s45_s8, %s45_s8 }
  0x1e   :  { %p904_p10 = scmp.ne.s32.totalorder %s45_s8, %s903_s10  ;;  %p909_p12 = scmp.lt.s32.totalorder %s903_s10, %s903_s10 }
  0x20   :  { %p910_p13 = por %p909_p12, %p908_p11 }
  0x22   :  { %p911_p0 = pnand %p910_p13, %p904_p10 }
  0x24   :  { %914 = shalt.err (!%p911_p0)
}
  0x25   :  { %47 = dma.hbm_to_vmem [thread:$0]  %s1025_s2, 64, %s45_s8, [#allocation6]  }
  0x26   :  { %s923_s13 = scalar_lea.vmem %s54_s1, 4096  ;;  %p928_p2 = scmp.lt.s32.totalorder %s54_s1, %s54_s1 }
  0x27   :  { %p924_p1 = scmp.ne.s32.totalorder %s54_s1, %s923_s13  ;;  %p929_p3 = scmp.lt.s32.totalorder %s923_s13, %s923_s13 }
  0x29   :  { %p930_p4 = por %p929_p3, %p928_p2 }
  0x2b   :  { %p931_p5 = pnand %p930_p4, %p924_p1 }
  0x2d   :  { %934 = shalt.err (!%p931_p5)
}
  0x2e   :  { %59 = dma.hbm_to_vmem [thread:$0]  %s1026_s3, 4096, %s54_s1, [#allocation9], %s967_s28, %s967_s28, %s968_s29  }
  0x2f   :  { %955 = dma.done.wait [#allocation3], 128  }
  0x30   :  { %956 = vsyncadd [#allocation3], 4294967168 }
  0x31   :  { %957 = dma.done.wait [#allocation6], 2112  }
  0x32   :  { %958 = vsyncadd [#allocation6], 4294965184 }
  0x33   :  { %959 = dma.done.wait [#allocation9], 4096  }
  0x34   :  { %960 = vsyncadd [#allocation9], 4294963200  ;;  %v971_v0 = vmov 0   ;;  %v790_v1 = vld [vmem:[#allocation5 + $0x64] ss:$16 sps:$4 sm:$0xff]   ;;  %v815_v17 = vld [vmem:[#allocation8 + $0x78] sm:$0xff]   ;;  %v95_v50 = vlaneseq }
  0x35   :  { %236 = vmatprep.mubr.bf16.mxu0 %v971_v0  ;;  %279 = vmatprep.mubr.bf16.mxu1 %v971_v0  ;;  %v792_v2 = vld [vmem:[#allocation5 + $0x6c] ss:$16 sps:$4 sm:$0xff]   ;;  %v794_v3 = vld [vmem:[#allocation5 + $0x60] ss:$16 sps:$4 sm:$0xff]   ;;  %v795_v4 = vld [vmem:[#allocation5 + $0x68] ss:$16 sps:$4 sm:$0xff]  }
  0x36   :  { %212 = vmatprep.subr.bf16.mxu0 %v790_v1  ;;  %255 = vmatprep.subr.bf16.mxu1 %v792_v2  ;;  %v796_v5 = vld [vmem:[#allocation5 + $0x44] ss:$16 sps:$4 sm:$0xff]   ;;  %v798_v6 = vld [vmem:[#allocation5 + $0x4c] ss:$16 sps:$4 sm:$0xff]   ;;  %v800_v7 = vld [vmem:[#allocation5 + $0x40] ss:$16 sps:$4 sm:$0xff]  }
  0x37   :  { %213 = vmatpush1.bf16.msra.mxu0 %v794_v3  ;;  %256 = vmatpush1.bf16.msra.mxu1 %v795_v4  ;;  %v801_v8 = vld [vmem:[#allocation5 + $0x48] ss:$16 sps:$4 sm:$0xff]   ;;  %v802_v9 = vld [vmem:[#allocation5 + $0x24] ss:$16 sps:$4 sm:$0xff]   ;;  %v804_v10 = vld [vmem:[#allocation5 + $0x2c] ss:$16 sps:$4 sm:$0xff]  }
  0x38   :  { %214 = vmatprep.subr.bf16.mxu0 %v796_v5  ;;  %257 = vmatprep.subr.bf16.mxu1 %v798_v6  ;;  %v806_v11 = vld [vmem:[#allocation5 + $0x20] ss:$16 sps:$4 sm:$0xff]   ;;  %v807_v12 = vld [vmem:[#allocation5 + $0x28] ss:$16 sps:$4 sm:$0xff]   ;;  %v808_v13 = vld [vmem:[#allocation5 + $0x4] ss:$16 sps:$4 sm:$0xff]  }
  0x39   :  { %v810_v14 = vld [vmem:[#allocation5 + $0xc] ss:$16 sps:$4 sm:$0xff]   ;;  %v812_v15 = vld [vmem:[#allocation5] ss:$16 sps:$4 sm:$0xff]   ;;  %v813_v16 = vld [vmem:[#allocation5 + $0x8] ss:$16 sps:$4 sm:$0xff]  }
  0x3a   :  { %v814_v18 = vld [vmem:[#allocation2] sm:$0xff]   ;;  %vm200_vm0 = vcmask 523264   ;;  %v823_v26 = vld [vmem:[#allocation8 + $0x68] sm:$0xff]   ;;  %v827_v30 = vld [vmem:[#allocation8 + $0x60] sm:$0xff]   ;;  %v96_v51 = vshrl.u32 %v95_v50, 7 }
  0x3b   :  { %215 = vmatpush1.bf16.msra.mxu0 %v800_v7  ;;  %258 = vmatpush1.bf16.msra.mxu1 %v801_v8  ;;  %v816_v19 = vld [vmem:[#allocation8 + $0xf8] sm:$0xff]   ;;  %v819_v22 = vld [vmem:[#allocation8 + $0x70] sm:$0xff]   ;;  %v824_v27 = vld [vmem:[#allocation8 + $0xe8] sm:$0xff]  }
  0x3c   :  { %216 = vmatprep.subr.bf16.mxu0 %v802_v9  ;;  %259 = vmatprep.subr.bf16.mxu1 %v804_v10  ;;  %v817_v20 = vld [vmem:[#allocation8 + $0x38] sm:$0xff]   ;;  %v820_v23 = vld [vmem:[#allocation8 + $0xf0] sm:$0xff]   ;;  %v825_v28 = vld [vmem:[#allocation8 + $0x28] sm:$0xff]   ;;  %v101_v52 = vsub.s32 1, %v96_v51  ;;  %v109_v53 = vsub.s32 3, %v96_v51  ;;  %v97_v54 = vsub.s32 0, %v96_v51 }
  0x3d   :  { %v818_v21 = vld [vmem:[#allocation8 + $0xb8] sm:$0xff]   ;;  %v821_v24 = vld [vmem:[#allocation8 + $0x30] sm:$0xff]   ;;  %v826_v29 = vld [vmem:[#allocation8 + $0xa8] sm:$0xff]   ;;  %v105_v55 = vsub.s32 2, %v96_v51 }
  0x3e   :  { %v822_v25 = vld [vmem:[#allocation8 + $0xb0] sm:$0xff]   ;;  %v828_v31 = vld [vmem:[#allocation8 + $0xe0] sm:$0xff]   ;;  %v831_v34 = vld [vmem:[#allocation8 + $0x58] sm:$0xff]  }
  0x3f   :  { %217 = vmatpush1.bf16.msra.mxu0 %v806_v11  ;;  %260 = vmatpush1.bf16.msra.mxu1 %v807_v12  ;;  %v829_v32 = vld [vmem:[#allocation8 + $0x20] sm:$0xff]   ;;  %v832_v35 = vld [vmem:[#allocation8 + $0xd8] sm:$0xff]   ;;  %v835_v38 = vld [vmem:[#allocation8 + $0x50] sm:$0xff]  }
  0x40   :  { %218 = vmatprep.subr.bf16.mxu0 %v808_v13  ;;  %261 = vmatprep.subr.bf16.mxu1 %v810_v14  ;;  %v830_v33 = vld [vmem:[#allocation8 + $0xa0] sm:$0xff]   ;;  %v833_v36 = vld [vmem:[#allocation8 + $0x18] sm:$0xff]   ;;  %v836_v39 = vld [vmem:[#allocation8 + $0xd0] sm:$0xff]  }
  0x41   :  { %v834_v37 = vld [vmem:[#allocation8 + $0x98] sm:$0xff]   ;;  %v837_v40 = vld [vmem:[#allocation8 + $0x10] sm:$0xff]   ;;  %v839_v42 = vld [vmem:[#allocation8 + $0x48] sm:$0xff]  }
  0x42   :  { %v838_v41 = vld [vmem:[#allocation8 + $0x90] sm:$0xff]   ;;  %v840_v43 = vld [vmem:[#allocation8 + $0xc8] sm:$0xff]   ;;  %v843_v46 = vld [vmem:[#allocation8 + $0x40] sm:$0xff]  }
  0x43   :  { %219 = vmatpush1.bf16.msra.mxu0 %v812_v15  ;;  %262 = vmatpush1.bf16.msra.mxu1 %v813_v16  ;;  %v841_v44 = vld [vmem:[#allocation8 + $0x8] sm:$0xff]   ;;  %v844_v47 = vld [vmem:[#allocation8 + $0xc0] sm:$0xff]   ;;  %v93_v56 = vld [vmem:[#allocation7] sm:$0xf] }
  0x44   :  { %734 = vmatprep.subr.bf16.mxu0 %v815_v17  ;;  %756 = vmatprep.subr.bf16.mxu1 %v816_v19  ;;  %v842_v45 = vld [vmem:[#allocation8 + $0x88] sm:$0xff]   ;;  %v845_v48 = vld [vmem:[#allocation8] sm:$0xff]   ;;  %v102_v59 = vrot.slane %v93_v56, %v101_v52  ;;  %v110_v60 = vrot.slane %v93_v56, %v109_v53  ;;  %v98_v61 = vrot.slane %v93_v56, %v97_v54 }
  0x45   :  { %v846_v49 = vld [vmem:[#allocation8 + $0x80] sm:$0xff]   ;;  %v106_v62 = vrot.slane %v93_v56, %v105_v55 }
  0x46   :  { %697 = vmatmul.mubr.msk.bf16.vlgmr.msra.gmra.mxu0 %vm200_vm0, %v814_v18  ;;  %698 = vmatmul.mubr.msk.bf16.vlgmr.msra.gmra.mxu1 %vm200_vm0, %v814_v18 }
  0x47   :  { %735 = vmatpush3.bf16.msra.mxu0 %v817_v20  ;;  %757 = vmatpush3.bf16.msra.mxu1 %v818_v21 }
  0x48   :  { %736 = vmatprep.subr.bf16.mxu0 %v819_v22  ;;  %758 = vmatprep.subr.bf16.mxu1 %v820_v23 }
  0x4b   :  { %737 = vmatpush3.bf16.msra.mxu0 %v821_v24  ;;  %759 = vmatpush3.bf16.msra.mxu1 %v822_v25 }
  0x4c   :  { %738 = vmatprep.subr.bf16.mxu0 %v823_v26  ;;  %760 = vmatprep.subr.bf16.mxu1 %v824_v27  ;;  %v699_v27 = vld [vmem:[%s1027_s4] ss:$0 sm:$0xff]  ;;  %s972_s4 = smov [#allocation10]  }
  0x4d   :  { %s666_s15 = sshll.u32 %s972_s4, 4  ;;  %s667_s15 = int_to_ptr.vmem [resolvable:$true] %s666_s15 }
  0x4e   :  { %s935_s16 = scalar_lea.vmem %s667_s15, 256  ;;  %p940_p7 = scmp.lt.s32.totalorder %s667_s15, %s667_s15 }
  0x4f   :  { %739 = vmatpush3.bf16.msra.mxu0 %v825_v28  ;;  %761 = vmatpush3.bf16.msra.mxu1 %v826_v29  ;;  %p936_p6 = scmp.ne.s32.totalorder %s667_s15, %s935_s16  ;;  %p941_p8 = scmp.lt.s32.totalorder %s935_s16, %s935_s16 }
  0x50   :  { %740 = vmatprep.subr.bf16.mxu0 %v827_v30  ;;  %762 = vmatprep.subr.bf16.mxu1 %v828_v31 }
  0x51   :  { %p942_p9 = por %p941_p8, %p940_p7 }
  0x53   :  { %741 = vmatpush3.bf16.msra.mxu0 %v829_v32  ;;  %763 = vmatpush3.bf16.msra.mxu1 %v830_v33  ;;  %p943_p10 = pnand %p942_p9, %p936_p6 }
  0x54   :  { %742 = vmatprep.subr.bf16.mxu0 %v831_v34  ;;  %764 = vmatprep.subr.bf16.mxu1 %v832_v35 }
  0x57   :  { %743 = vmatpush3.bf16.msra.mxu0 %v833_v36  ;;  %765 = vmatpush3.bf16.msra.mxu1 %v834_v37 }
  0x58   :  { %744 = vmatprep.subr.bf16.mxu0 %v835_v38  ;;  %766 = vmatprep.subr.bf16.mxu1 %v836_v39 }
  0x5b   :  { %745 = vmatpush3.bf16.msra.mxu0 %v837_v40  ;;  %767 = vmatpush3.bf16.msra.mxu1 %v838_v41 }
  0x5c   :  { %746 = vmatprep.subr.bf16.mxu0 %v839_v42  ;;  %768 = vmatprep.subr.bf16.mxu1 %v840_v43 }
  0x5f   :  { %747 = vmatpush3.bf16.msra.mxu0 %v841_v44  ;;  %769 = vmatpush3.bf16.msra.mxu1 %v842_v45 }
  0x60   :  { %748 = vmatprep.subr.bf16.mxu0 %v843_v46  ;;  %770 = vmatprep.subr.bf16.mxu1 %v844_v47 }
  0x63   :  { %749 = vmatpush3.bf16.msra.mxu0 %v845_v48  ;;  %771 = vmatpush3.bf16.msra.mxu1 %v846_v49 }
 0x106   :  { %v238_v57 = vpop.f32.mrf.mxu0  ;;  %v281_v58 = vpop.f32.mrf.mxu1 }
 0x107   :  { %v239_v7 = vadd.f32 %v238_v57, %v98_v61  ;;  %v282_v8 = vadd.f32 %v281_v58, %v106_v62 }
 0x108   :  { %v240_v63 = vpop.f32.mrf.mxu0  ;;  %v283_v0 = vpop.f32.mrf.mxu1 }
 0x109   :  { %v241_v3 = vadd.f32 %v240_v63, %v102_v59  ;;  %v284_v4 = vadd.f32 %v283_v0, %v110_v60  ;;  %v290_v19 = vmax.f32 %v239_v7, 0.0  ;;  %v292_v20 = vmax.f32 %v282_v8, 0.0 }
 0x10a   :  { %v242_v1 = vpop.f32.mrf.mxu0  ;;  %v285_v2 = vpop.f32.mrf.mxu1 }
 0x10b   :  { %v243_v5 = vadd.f32 %v242_v1, %v98_v61  ;;  %v286_v6 = vadd.f32 %v285_v2, %v106_v62  ;;  %v291_v15 = vmax.f32 %v241_v3, 0.0  ;;  %v293_v16 = vmax.f32 %v284_v4, 0.0 }
 0x10c   :  { %v244_v9 = vpop.f32.mrf.mxu0  ;;  %v287_v10 = vpop.f32.mrf.mxu1 }
 0x10d   :  { %v245_v11 = vadd.f32 %v244_v9, %v102_v59  ;;  %v288_v12 = vadd.f32 %v287_v10, %v110_v60  ;;  %v294_v13 = vmax.f32 %v243_v5, 0.0  ;;  %v296_v14 = vmax.f32 %v286_v6, 0.0 }
 0x10f   :  { %v295_v17 = vmax.f32 %v245_v11, 0.0  ;;  %v297_v18 = vmax.f32 %v288_v12, 0.0  ;;  %v298_v23 = vpack.c.bf16 %v294_v13, %v290_v19  ;;  %v300_v24 = vpack.c.bf16 %v296_v14, %v292_v20 }
 0x111   :  { %v299_v21 = vpack.c.bf16 %v295_v17, %v291_v15  ;;  %v301_v22 = vpack.c.bf16 %v297_v18, %v293_v16 }
 0x113   :  { %597 = vmatprep.mubr.bf16.mxu0 %v299_v21  ;;  %638 = vmatprep.mubr.bf16.mxu1 %v301_v22 }
 0x114   :  { %598 = vmatmul.mubr.bf16.vlgmr.msra.gmra.mxu0 %v298_v23  ;;  %639 = vmatmul.mubr.bf16.vlgmr.msra.gmra.mxu1 %v300_v24 }
 0x1d4   :  { %v750_v25 = vpop.f32.mrf.mxu0  ;;  %v772_v26 = vpop.f32.mrf.mxu1 }
 0x1d6   :  { %v751_v28 = vpop.f32.mrf.mxu0  ;;  %v773_v29 = vpop.f32.mrf.mxu1 }
 0x1d7   :  { %v752_v30 = vadd.f32 %v751_v28, %v750_v25  ;;  %v774_v34 = vadd.f32 %v773_v29, %v772_v26 }
 0x1d8   :  { %v753_v31 = vpop.f32.mrf.mxu0  ;;  %v775_v32 = vpop.f32.mrf.mxu1 }
 0x1d9   :  { %v600_v33 = vadd.f32 %v752_v30, %v699_v27 }
 0x1da   :  { %v754_v35 = vpop.f32.mrf.mxu0  ;;  %v776_v36 = vpop.f32.mrf.mxu1 }
 0x1db   :  { %v641_v37 = vadd.f32 %v774_v34, %v600_v33  ;;  %v755_v38 = vadd.f32 %v754_v35, %v753_v31  ;;  %v777_v41 = vadd.f32 %v776_v36, %v775_v32 }
 0x1dd   :  { %v732_v39 = vmul.f32 -1.442695, %v641_v37  ;;  %v603_v40 = vadd.f32 %v755_v38, %v699_v27 }
 0x1df   :  { %847 = vpow2.f32 %v732_v39  ;;  %v644_v42 = vadd.f32 %v777_v41, %v603_v40 }
 0x1e1   :  { %v733_v43 = vmul.f32 -1.442695, %v644_v42 }
 0x1e3   :  { %849 = vpow2.f32 %v733_v43 }
 0x1ec   :  { %v848_v44 = vpop.eup %847 }
 0x1ed   :  { %v653_v45 = vadd.f32 1.0, %v848_v44 }
 0x1ef   :  { %851 = vrcp.f32 %v653_v45 }
 0x1f0   :  { %v850_v46 = vpop.eup %849 }
 0x1f1   :  { %v654_v47 = vadd.f32 1.0, %v850_v46 }
 0x1f3   :  { %853 = vrcp.f32 %v654_v47 }
 0x1fc   :  { %v852_v48 = vpop.eup %851 }
 0x1fd   :  { %659 = vst [vmem:[#allocation10] sm:$0xff] %v852_v48 }
 0x200   :  { %v854_v49 = vpop.eup %853 }
 0x201   :  { %660 = vst [vmem:[#allocation10 + $0x8] sm:$0xff] %v854_v49 }
 0x202   :  { %946 = shalt.err (!%p943_p10)
}
 0x203   :  { %s973_s17 = smov 128   ;;  %s974_s18 = smov 8  }
 0x204   :  { %672 = dma.vmem_to_hbm [thread:$0]  %s667_s15, 256, %s1028_s5, [#allocation4], %s973_s17, %s973_s17, %s974_s18  }
 0x205   :  { %961 = dma.done.wait [#allocation4], 256  }
 0x206   :  { %962 = vsyncadd [#allocation4], 4294967040 }
 0x207   :  { %676 = vsyncpa [#allocation3], 1 }
 0x208   :  { %677 = vsyncpa [#allocation6], 1 }
 0x209   :  { %678 = vsyncpa [#allocation9], 1 }
 0x20a   :  { %679 = vsyncpa [#allocation4], 1 }

</bundles_post_ra>
